<compile_context>
chip_gen: v5e
topology: v5e:2x2
jax: 0.10.0
libtpu: 0.0.40
codegen_flags: <defaults>
</compile_context>

<pallas_src>
import functools

import jax
import jax.numpy as jnp
from jax.experimental import pallas as pl
from jax.experimental.pallas import tpu as pltpu


def _round_up(n, m):
    return ((n + m - 1) // m) * m


def _place_cols(a, width, offset):
    """Embed a's columns at [offset, offset + a.shape[1]) of a zero (rows, width)."""
    out = jnp.zeros((a.shape[0], width), a.dtype)
    return out.at[:, offset:offset + a.shape[1]].set(a)


def _chip_caps():
    """Per-generation VMEM budgets and elementwise dtype selection."""
    try:
        kind = jax.devices()[0].device_kind.lower()
    except Exception:
        kind = ""
    is_v7 = ("v7" in kind) or ("7x" in kind)
    is_old = any(k in kind for k in ("v2", "v3", "v4", "v5"))
    if is_v7:
        # 64 MiB VMEM per TensorCore on v7x: leave headroom for compiler scratch.
        return dict(vmem_limit=48 << 20, tile_budget=32 << 20, bf16_ew=True)
    if is_old:
        # 128 MiB physical VMEM; v5e's default scoped limit is only ~16 MiB, so
        # raise it explicitly.  No bf16 VPU -> keep the elementwise chain in f32.
        return dict(vmem_limit=100 << 20, tile_budget=64 << 20, bf16_ew=False)
    # v6e (and unknown/newer): 128 MiB VMEM, bf16 VPU available.
    return dict(vmem_limit=100 << 20, tile_budget=64 << 20, bf16_ew=True)


def _mcc_forward_kernel(
    x_ref,
    w_fe1_ref, b_fe1_ref,
    w_fe2_ref, b_fe2_ref,
    w_cl1_ref, b_cl1_ref,
    w_mainh_ref, w_auxh_ref, b_head_ref,
    out_ref,
    *, ew_dtype,
):
    # bf16 MXU operands, f32 accumulation; bias/ReLU/cast chain in `ew_dtype`
    # (bf16 on v6e/v7x to relieve the VALU slot, f32 on v5e).
    zero = jnp.zeros((), ew_dtype)
    x = x_ref[...].astype(jnp.bfloat16)

    # feature_extractor: Linear -> ReLU -> Linear
    h = jnp.dot(x, w_fe1_ref[...], preferred_element_type=jnp.float32)
    h = jnp.maximum(h.astype(ew_dtype) + b_fe1_ref[...], zero).astype(jnp.bfloat16)
    feat = jnp.dot(h, w_fe2_ref[...], preferred_element_type=jnp.float32)
    feat = (feat.astype(ew_dtype) + b_fe2_ref[...]).astype(jnp.bfloat16)

    # dropout(p=0.0) is identity.

    # classifier first Linear -> ReLU
    c = jnp.dot(feat, w_cl1_ref[...], preferred_element_type=jnp.float32)
    c = jnp.maximum(c.astype(ew_dtype) + b_cl1_ref[...], zero).astype(jnp.bfloat16)

    # Merged heads: main logits land in cols [0:out_features], aux logits in
    # cols [out_features:out_features+task_num] of a single lane-dense block.
    head = (jnp.dot(c, w_mainh_ref[...], preferred_element_type=jnp.float32)
            + jnp.dot(feat, w_auxh_ref[...], preferred_element_type=jnp.float32)
            + b_head_ref[...])
    out_ref[...] = head.astype(out_ref.dtype)


def multi_centroid_classifier_forward(x, params, *, block_b=1024):
    """Full forward pass inside one Pallas kernel, tiled over the batch axis.

    x: [B, in_features] float32
    params: dict of pre-transposed weights ([in, out]) and biases ([1, out]).
    Returns (main_logits [B, out_features], aux_logits [B, task_num]).
    """
    B, in_features = x.shape
    hidden = params["w_fe1"].shape[1]
    out_features = params["w_cl2"].shape[1]
    task_num = params["w_aux"].shape[1]

    caps = _chip_caps()
    ew_dtype = jnp.bfloat16 if caps["bf16_ew"] else jnp.float32

    # Merged, lane-dense head width.  (For best MXU/layout efficiency `hidden`
    # should be a multiple of 128 -- true for the module default 512.)
    combined = out_features + task_num
    combined_pad = _round_up(combined, 128)

    # --- parameters: bf16 MXU operands; biases in the elementwise dtype.
    w_fe1 = params["w_fe1"].astype(jnp.bfloat16)
    b_fe1 = params["b_fe1"].astype(ew_dtype)
    w_fe2 = params["w_fe2"].astype(jnp.bfloat16)
    b_fe2 = params["b_fe2"].astype(ew_dtype)
    w_cl1 = params["w_cl1"].astype(jnp.bfloat16)
    b_cl1 = params["b_cl1"].astype(ew_dtype)
    w_mainh = _place_cols(params["w_cl2"], combined_pad, 0).astype(jnp.bfloat16)
    w_auxh = _place_cols(params["w_aux"], combined_pad, out_features).astype(jnp.bfloat16)
    b_head = (_place_cols(params["b_cl2"], combined_pad, 0)
              + _place_cols(params["b_aux"], combined_pad, out_features)
              ).astype(jnp.float32)

    # --- VMEM budget -> batch tile size.
    weight_bytes = (2 * (in_features * hidden + 2 * hidden * hidden
                         + 2 * hidden * combined_pad)
                    + 4 * (3 * hidden + combined_pad))
    avail = max(caps["tile_budget"] - weight_bytes, 4 << 20)
    per_row = (2 * in_features * 4          # double-buffered input tile
               + 2 * combined_pad * 4       # double-buffered merged output tile
               + 8 * hidden * 4             # live activation temporaries (f32 bound)
               + 2 * combined_pad * 4)      # head accumulator
    tb_budget = max(128, (avail // per_row) // 128 * 128)

    # At least two grid steps (when B allows) so "parallel" can shard the batch
    # axis across v7x's two TensorCores; free on single-TC v5e/v6e.
    half = -(-B // 2)
    if half >= 128:
        tb_split = _round_up(half, 128)     # keep MXU M and bf16 packing aligned
    elif half > 8:
        tb_split = _round_up(half, 16)
    else:
        tb_split = 8
    tb = max(8, min(tb_budget, block_b, tb_split))

    padded_b = _round_up(B, tb)
    x_in = x if padded_b == B else jnp.pad(x, ((0, padded_b - B), (0, 0)))
    grid = (padded_b // tb,)

    def tile_map(i):
        return (i, 0)

    def resident(arr):
        # Full-array block, constant index -> DMA'd once; single-buffered so
        # resident weights take half the VMEM.
        return pl.BlockSpec(arr.shape, lambda i: (0, 0),
                            pipeline_mode=pl.Buffered(1))

    in_specs = [
        pl.BlockSpec((tb, in_features), tile_map),
        resident(w_fe1), resident(b_fe1),
        resident(w_fe2), resident(b_fe2),
        resident(w_cl1), resident(b_cl1),
        resident(w_mainh), resident(w_auxh), resident(b_head),
    ]
    out_specs = pl.BlockSpec((tb, combined_pad), tile_map)

    flops = 2 * padded_b * hidden * (in_features + 2 * hidden + 2 * combined_pad)
    bytes_accessed = x_in.size * 4 + weight_bytes + padded_b * combined_pad * 4

    kernel = functools.partial(_mcc_forward_kernel, ew_dtype=ew_dtype)
    out = pl.pallas_call(
        kernel,
        grid=grid,
        in_specs=in_specs,
        out_specs=out_specs,
        out_shape=jax.ShapeDtypeStruct((padded_b, combined_pad), jnp.float32),
        compiler_params=pltpu.CompilerParams(
            dimension_semantics=("parallel",),
            vmem_limit_bytes=caps["vmem_limit"],
        ),
        cost_estimate=pl.CostEstimate(
            flops=int(flops), transcendentals=0,
            bytes_accessed=int(bytes_accessed)),
    )(x_in, w_fe1, b_fe1, w_fe2, b_fe2, w_cl1, b_cl1, w_mainh, w_auxh, b_head)

    # Strip batch padding and split the merged head back into (main, aux).
    main = out[:B, :out_features]
    aux = out[:B, out_features:out_features + task_num]
    return main, aux


def _init_linear(key, fan_in, fan_out):
    """Deterministic init; weight returned as [in, out] (transposed vs torch)."""
    kw, kb = jax.random.split(key)
    bound = 1.0 / jnp.sqrt(fan_in)
    w = jax.random.uniform(kw, (fan_in, fan_out), jnp.float32, -bound, bound)
    b = jax.random.uniform(kb, (1, fan_out), jnp.float32, -bound, bound)
    return w, b


def make_params(key, in_features, hidden_features, out_features, task_num):
    keys = jax.random.split(key, 5)
    w_fe1, b_fe1 = _init_linear(keys[0], in_features, hidden_features)
    w_fe2, b_fe2 = _init_linear(keys[1], hidden_features, hidden_features)
    w_cl1, b_cl1 = _init_linear(keys[2], hidden_features, hidden_features)
    w_cl2, b_cl2 = _init_linear(keys[3], hidden_features, out_features)
    w_aux, b_aux = _init_linear(keys[4], hidden_features, task_num)
    return dict(
        w_fe1=w_fe1, b_fe1=b_fe1,
        w_fe2=w_fe2, b_fe2=b_fe2,
        w_cl1=w_cl1, b_cl1=b_cl1,
        w_cl2=w_cl2, b_cl2=b_cl2,
        w_aux=w_aux, b_aux=b_aux,
    )


def reference_forward(x, p):
    """Pure-JAX f32 reference mirroring the PyTorch forward."""
    h = jnp.maximum(x @ p["w_fe1"] + p["b_fe1"], 0.0)
    feat = h @ p["w_fe2"] + p["b_fe2"]
    c = jnp.maximum(feat @ p["w_cl1"] + p["b_cl1"], 0.0)
    main = c @ p["w_cl2"] + p["b_cl2"]
    aux = feat @ p["w_aux"] + p["b_aux"]
    return main, aux


if __name__ == "__main__":
    # Small shapes consistent with the module's forward.
    B = 8
    IN_FEATURES = 64
    HIDDEN_FEATURES = 128     # module default is 512; kept small for the demo
    OUT_FEATURES = 16
    TASK_NUM = 4              # class_to_task_mapping.max() + 1 in the module

    key = jax.random.PRNGKey(0)
    kx, kp = jax.random.split(key)
    x = jax.random.normal(kx, (B, IN_FEATURES), jnp.float32)
    params = make_params(kp, IN_FEATURES, HIDDEN_FEATURES, OUT_FEATURES, TASK_NUM)

    main_logits, aux_logits = multi_centroid_classifier_forward(x, params)
    jax.block_until_ready((main_logits, aux_logits))

    ref_main, ref_aux = reference_forward(x, params)
    assert main_logits.shape == (B, OUT_FEATURES)
    assert aux_logits.shape == (B, TASK_NUM)
    # bf16 matmul operands (+ bf16 elementwise on v6e/v7x) with f32 accumulation
    # -> looser tolerance than pure f32.
    assert jnp.allclose(main_logits, ref_main, atol=4e-2, rtol=4e-2)
    assert jnp.allclose(aux_logits, ref_aux, atol=4e-2, rtol=4e-2)

    print("KERNEL_OK")
</pallas_src>

<mosaic_0001>
module attributes {stable_mosaic.version = 11 : i64} {
  func.func @_mcc_forward_kernel(%arg0: i32, %arg1: memref<8x64xf32, #tpu.memory_space<vmem>>, %arg2: memref<64x128xbf16, #tpu.memory_space<vmem>>, %arg3: memref<1x128xbf16, #tpu.memory_space<vmem>>, %arg4: memref<128x128xbf16, #tpu.memory_space<vmem>>, %arg5: memref<1x128xbf16, #tpu.memory_space<vmem>>, %arg6: memref<128x128xbf16, #tpu.memory_space<vmem>>, %arg7: memref<1x128xbf16, #tpu.memory_space<vmem>>, %arg8: memref<128x128xbf16, #tpu.memory_space<vmem>>, %arg9: memref<128x128xbf16, #tpu.memory_space<vmem>>, %arg10: memref<1x128xf32, #tpu.memory_space<vmem>>, %arg11: memref<8x128xf32, #tpu.memory_space<vmem>>) attributes {dimension_semantics = [#tpu.dimension_semantics<parallel>], iteration_bounds = array<i64: 1>, scalar_prefetch = 0 : i64, scratch_operands = 0 : i64, tpu.core_type = #tpu.core_type<tc>, window_params = [{transform_indices = @transform_0, window_bounds = array<i64: 8, 64>}, {pipeline_mode = #tpu.pipeline_mode<synchronous>, transform_indices = @transform_1, window_bounds = array<i64: 64, 128>}, {pipeline_mode = #tpu.pipeline_mode<synchronous>, transform_indices = @transform_2, window_bounds = array<i64: 1, 128>}, {pipeline_mode = #tpu.pipeline_mode<synchronous>, transform_indices = @transform_3, window_bounds = array<i64: 128, 128>}, {pipeline_mode = #tpu.pipeline_mode<synchronous>, transform_indices = @transform_4, window_bounds = array<i64: 1, 128>}, {pipeline_mode = #tpu.pipeline_mode<synchronous>, transform_indices = @transform_5, window_bounds = array<i64: 128, 128>}, {pipeline_mode = #tpu.pipeline_mode<synchronous>, transform_indices = @transform_6, window_bounds = array<i64: 1, 128>}, {pipeline_mode = #tpu.pipeline_mode<synchronous>, transform_indices = @transform_7, window_bounds = array<i64: 128, 128>}, {pipeline_mode = #tpu.pipeline_mode<synchronous>, transform_indices = @transform_8, window_bounds = array<i64: 128, 128>}, {pipeline_mode = #tpu.pipeline_mode<synchronous>, transform_indices = @transform_9, window_bounds = array<i64: 1, 128>}, {transform_indices = @transform_10, window_bounds = array<i64: 8, 128>}]} {
    %c0 = arith.constant 0 : index
    %c0_0 = arith.constant 0 : index
    %0 = vector.load %arg1[%c0, %c0_0] : memref<8x64xf32, #tpu.memory_space<vmem>>, vector<8x64xf32>
    %1 = arith.truncf %0 : vector<8x64xf32> to vector<8x64xbf16>
    %c0_1 = arith.constant 0 : index
    %c0_2 = arith.constant 0 : index
    %2 = vector.load %arg2[%c0_1, %c0_2] : memref<64x128xbf16, #tpu.memory_space<vmem>>, vector<64x128xbf16>
    %cst = arith.constant dense<0.000000e+00> : vector<8x128xf32>
    %3 = tpu.matmul %1, %2, %cst {dimension_numbers = #tpu.dot_dimension_numbers<[1], [0], [0], [1], [0, 0, 1, 1], [], []>} : vector<8x64xbf16>, vector<64x128xbf16>, vector<8x128xf32> -> vector<8x128xf32>
    %4 = arith.truncf %3 : vector<8x128xf32> to vector<8x128xbf16>
    %c0_3 = arith.constant 0 : index
    %c0_4 = arith.constant 0 : index
    %5 = vector.load %arg3[%c0_3, %c0_4] : memref<1x128xbf16, #tpu.memory_space<vmem>>, vector<1x128xbf16>
    %6 = vector.broadcast %5 : vector<1x128xbf16> to vector<8x128xbf16>
    %7 = arith.addf %4, %6 : vector<8x128xbf16>
    %cst_5 = arith.constant 0.000000e+00 : bf16
    %8 = vector.broadcast %cst_5 : bf16 to vector<8x128xbf16>
    %9 = arith.maximumf %7, %8 : vector<8x128xbf16>
    %c0_6 = arith.constant 0 : index
    %c0_7 = arith.constant 0 : index
    %10 = vector.load %arg4[%c0_6, %c0_7] : memref<128x128xbf16, #tpu.memory_space<vmem>>, vector<128x128xbf16>
    %cst_8 = arith.constant dense<0.000000e+00> : vector<8x128xf32>
    %11 = tpu.matmul %9, %10, %cst_8 {dimension_numbers = #tpu.dot_dimension_numbers<[1], [0], [0], [1], [0, 0, 1, 1], [], []>} : vector<8x128xbf16>, vector<128x128xbf16>, vector<8x128xf32> -> vector<8x128xf32>
    %12 = arith.truncf %11 : vector<8x128xf32> to vector<8x128xbf16>
    %c0_9 = arith.constant 0 : index
    %c0_10 = arith.constant 0 : index
    %13 = vector.load %arg5[%c0_9, %c0_10] : memref<1x128xbf16, #tpu.memory_space<vmem>>, vector<1x128xbf16>
    %14 = vector.broadcast %13 : vector<1x128xbf16> to vector<8x128xbf16>
    %15 = arith.addf %12, %14 : vector<8x128xbf16>
    %c0_11 = arith.constant 0 : index
    %c0_12 = arith.constant 0 : index
    %16 = vector.load %arg6[%c0_11, %c0_12] : memref<128x128xbf16, #tpu.memory_space<vmem>>, vector<128x128xbf16>
    %cst_13 = arith.constant dense<0.000000e+00> : vector<8x128xf32>
    %17 = tpu.matmul %15, %16, %cst_13 {dimension_numbers = #tpu.dot_dimension_numbers<[1], [0], [0], [1], [0, 0, 1, 1], [], []>} : vector<8x128xbf16>, vector<128x128xbf16>, vector<8x128xf32> -> vector<8x128xf32>
    %18 = arith.truncf %17 : vector<8x128xf32> to vector<8x128xbf16>
    %c0_14 = arith.constant 0 : index
    %c0_15 = arith.constant 0 : index
    %19 = vector.load %arg7[%c0_14, %c0_15] : memref<1x128xbf16, #tpu.memory_space<vmem>>, vector<1x128xbf16>
    %20 = vector.broadcast %19 : vector<1x128xbf16> to vector<8x128xbf16>
    %21 = arith.addf %18, %20 : vector<8x128xbf16>
    %cst_16 = arith.constant 0.000000e+00 : bf16
    %22 = vector.broadcast %cst_16 : bf16 to vector<8x128xbf16>
    %23 = arith.maximumf %21, %22 : vector<8x128xbf16>
    %c0_17 = arith.constant 0 : index
    %c0_18 = arith.constant 0 : index
    %24 = vector.load %arg8[%c0_17, %c0_18] : memref<128x128xbf16, #tpu.memory_space<vmem>>, vector<128x128xbf16>
    %cst_19 = arith.constant dense<0.000000e+00> : vector<8x128xf32>
    %25 = tpu.matmul %23, %24, %cst_19 {dimension_numbers = #tpu.dot_dimension_numbers<[1], [0], [0], [1], [0, 0, 1, 1], [], []>} : vector<8x128xbf16>, vector<128x128xbf16>, vector<8x128xf32> -> vector<8x128xf32>
    %c0_20 = arith.constant 0 : index
    %c0_21 = arith.constant 0 : index
    %26 = vector.load %arg9[%c0_20, %c0_21] : memref<128x128xbf16, #tpu.memory_space<vmem>>, vector<128x128xbf16>
    %cst_22 = arith.constant dense<0.000000e+00> : vector<8x128xf32>
    %27 = tpu.matmul %15, %26, %cst_22 {dimension_numbers = #tpu.dot_dimension_numbers<[1], [0], [0], [1], [0, 0, 1, 1], [], []>} : vector<8x128xbf16>, vector<128x128xbf16>, vector<8x128xf32> -> vector<8x128xf32>
    %28 = arith.addf %25, %27 : vector<8x128xf32>
    %c0_23 = arith.constant 0 : index
    %c0_24 = arith.constant 0 : index
    %29 = vector.load %arg10[%c0_23, %c0_24] : memref<1x128xf32, #tpu.memory_space<vmem>>, vector<1x128xf32>
    %30 = vector.broadcast %29 : vector<1x128xf32> to vector<8x128xf32>
    %31 = arith.addf %28, %30 : vector<8x128xf32>
    %c0_25 = arith.constant 0 : index
    %c0_26 = arith.constant 0 : index
    %32 = vector.load %arg11[%c0_25, %c0_26] : memref<8x128xf32, #tpu.memory_space<vmem>>, vector<8x128xf32>
    tpu.vector_store %arg11[%c0_25, %c0_26], %31 {strides = array<i32>} : memref<8x128xf32, #tpu.memory_space<vmem>>, vector<8x128xf32>,
    return
  }
  func.func @transform_0(%arg0: i32) -> (i32, i32) {
    %c0_i32 = arith.constant 0 : i32
    %c0_i32_0 = arith.constant 0 : i32
    return %arg0, %c0_i32 : i32, i32
  }
  func.func @transform_1(%arg0: i32) -> (i32, i32) {
    %c0_i32 = arith.constant 0 : i32
    %c0_i32_0 = arith.constant 0 : i32
    %c0_i32_1 = arith.constant 0 : i32
    return %c0_i32, %c0_i32_0 : i32, i32
  }
  func.func @transform_2(%arg0: i32) -> (i32, i32) {
    %c0_i32 = arith.constant 0 : i32
    %c0_i32_0 = arith.constant 0 : i32
    %c0_i32_1 = arith.constant 0 : i32
    return %c0_i32, %c0_i32_0 : i32, i32
  }
  func.func @transform_3(%arg0: i32) -> (i32, i32) {
    %c0_i32 = arith.constant 0 : i32
    %c0_i32_0 = arith.constant 0 : i32
    %c0_i32_1 = arith.constant 0 : i32
    return %c0_i32, %c0_i32_0 : i32, i32
  }
  func.func @transform_4(%arg0: i32) -> (i32, i32) {
    %c0_i32 = arith.constant 0 : i32
    %c0_i32_0 = arith.constant 0 : i32
    %c0_i32_1 = arith.constant 0 : i32
    return %c0_i32, %c0_i32_0 : i32, i32
  }
  func.func @transform_5(%arg0: i32) -> (i32, i32) {
    %c0_i32 = arith.constant 0 : i32
    %c0_i32_0 = arith.constant 0 : i32
    %c0_i32_1 = arith.constant 0 : i32
    return %c0_i32, %c0_i32_0 : i32, i32
  }
  func.func @transform_6(%arg0: i32) -> (i32, i32) {
    %c0_i32 = arith.constant 0 : i32
    %c0_i32_0 = arith.constant 0 : i32
    %c0_i32_1 = arith.constant 0 : i32
    return %c0_i32, %c0_i32_0 : i32, i32
  }
  func.func @transform_7(%arg0: i32) -> (i32, i32) {
    %c0_i32 = arith.constant 0 : i32
    %c0_i32_0 = arith.constant 0 : i32
    %c0_i32_1 = arith.constant 0 : i32
    return %c0_i32, %c0_i32_0 : i32, i32
  }
  func.func @transform_8(%arg0: i32) -> (i32, i32) {
    %c0_i32 = arith.constant 0 : i32
    %c0_i32_0 = arith.constant 0 : i32
    %c0_i32_1 = arith.constant 0 : i32
    return %c0_i32, %c0_i32_0 : i32, i32
  }
  func.func @transform_9(%arg0: i32) -> (i32, i32) {
    %c0_i32 = arith.constant 0 : i32
    %c0_i32_0 = arith.constant 0 : i32
    %c0_i32_1 = arith.constant 0 : i32
    return %c0_i32, %c0_i32_0 : i32, i32
  }
  func.func @transform_10(%arg0: i32) -> (i32, i32) {
    %c0_i32 = arith.constant 0 : i32
    %c0_i32_0 = arith.constant 0 : i32
    return %arg0, %c0_i32 : i32, i32
  }
}

</mosaic_0001>

<bundles_post_ra>
// kernel: tpu_custom_call.1
= control target key start
LH: loop header
LB: loop body
LE: loop exit
PB: predicated region body
PF: predicated region fallthrough
CT: control target
= control target key end

     0   :  { %15 = vsyncpa [#allocation3], 0  ;;  %s1031_s0 = inlined_call_operand.hbm [shape: f32[8,64], index: 0, kind: input, shape index: {}]   ;;  %s1032_s1 = inlined_call_operand.hbm [shape: bf16[64,128], index: 1, kind: input, shape index: {}]   ;;  %s1033_s2 = inlined_call_operand.vmem [shape: bf16[1,128], index: 2, kind: input, shape index: {}]   ;;  %s1034_s3 = inlined_call_operand.hbm [shape: bf16[128,128], index: 3, kind: input, shape index: {}]   ;;  %s1035_s4 = inlined_call_operand.vmem [shape: bf16[1,128], index: 4, kind: input, shape index: {}]   ;;  %s1036_s5 = inlined_call_operand.hbm [shape: bf16[128,128], index: 5, kind: input, shape index: {}]   ;;  %s1037_s6 = inlined_call_operand.vmem [shape: bf16[1,128], index: 6, kind: input, shape index: {}]   ;;  %s1038_s7 = inlined_call_operand.hbm [shape: bf16[128,128], index: 7, kind: input, shape index: {}]   ;;  %s1039_s8 = inlined_call_operand.hbm [shape: bf16[128,128], index: 8, kind: input, shape index: {}]   ;;  %s1040_s9 = inlined_call_operand.vmem [shape: f32[1,128], index: 9, kind: input, shape index: {}]   ;;  %s1041_s10 = inlined_call_operand.hbm [shape: f32[8,128], index: 10, kind: output, shape index: {}]  }
   0x1   :  { %16 = vsyncpa [#allocation6], 0 }
   0x2   :  { %17 = vsyncpa [#allocation9], 0 }
   0x3   :  { %18 = vsyncpa [#allocation12], 0  ;;  %s35_s15 = sshll.u32 %s1032_s1, 4  ;;  %s36_s15 = int_to_ptr.hbm [resolvable:$true] %s35_s15 }
   0x4   :  { %19 = vsyncpa [#allocation4], 0  ;;  %s919_s16 = smov [#allocation5]   ;;  %s65_s20 = sshll.u32 %s1036_s5, 4  ;;  %s66_s20 = int_to_ptr.hbm [resolvable:$true] %s65_s20 }
   0x5   :  { %s37_s17 = sshll.u32 %s919_s16, 4  ;;  %s920_s21 = smov 64   ;;  %s38_s17 = int_to_ptr.vmem [resolvable:$true] %s37_s17 }
   0x6   :  { %s921_s22 = smov 4   ;;  %s922_s23 = smov [#allocation8]  }
   0x7   :  { %43 = dma.hbm_to_vmem [thread:$0]  %s36_s15, 512, %s38_s17, [#allocation6], %s920_s21, %s920_s21, %s921_s22  }
   0x8   :  { %s67_s24 = sshll.u32 %s922_s23, 4  ;;  %s25_s26 = sshll.u32 %s1031_s0, 4  ;;  %s68_s24 = int_to_ptr.vmem [resolvable:$true] %s67_s24  ;;  %s26_s26 = int_to_ptr.hbm [resolvable:$true] %s25_s26 }
   0x9   :  { %73 = dma.hbm_to_vmem [thread:$0]  %s66_s20, 1024, %s68_s24, [#allocation9], %s920_s21, %s920_s21, %s921_s22  }
   0xa   :  { %s50_s28 = sshll.u32 %s1034_s3, 4  ;;  %s923_s29 = smov [#allocation2]   ;;  %s51_s28 = int_to_ptr.hbm [resolvable:$true] %s50_s28 }
   0xb   :  { %s27_s30 = sshll.u32 %s923_s29, 4  ;;  %s924_s11 = smov [#allocation7]   ;;  %s28_s30 = int_to_ptr.vmem [resolvable:$true] %s27_s30 }
   0xc   :  { %30 = dma.hbm_to_vmem [thread:$0]  %s26_s26, 128, %s28_s30, [#allocation3]  }
   0xd   :  { %s52_s12 = sshll.u32 %s924_s11, 4  ;;  %s80_s0 = sshll.u32 %s1038_s7, 4  ;;  %s53_s12 = int_to_ptr.vmem [resolvable:$true] %s52_s12  ;;  %s81_s0 = int_to_ptr.hbm [resolvable:$true] %s80_s0 }
   0xe   :  { %58 = dma.hbm_to_vmem [thread:$0]  %s51_s28, 1024, %s53_s12, [#allocation6], %s920_s21, %s920_s21, %s921_s22  }
   0xf   :  { %s93_s3 = sshll.u32 %s1039_s8, 4  ;;  %s925_s17 = smov [#allocation10]   ;;  %s94_s3 = int_to_ptr.hbm [resolvable:$true] %s93_s3 }
  0x10   :  { %s82_s18 = sshll.u32 %s925_s17, 4  ;;  %s926_s19 = smov [#allocation11]   ;;  %s83_s18 = int_to_ptr.vmem [resolvable:$true] %s82_s18 }
  0x11   :  { %88 = dma.hbm_to_vmem [thread:$0]  %s81_s0, 1024, %s83_s18, [#allocation9], %s920_s21, %s920_s21, %s921_s22  }
  0x12   :  { %s95_s7 = sshll.u32 %s926_s19, 4  ;;  %s96_s7 = int_to_ptr.vmem [resolvable:$true] %s95_s7 }
  0x13   :  { %101 = dma.hbm_to_vmem [thread:$0]  %s94_s3, 1024, %s96_s7, [#allocation12], %s920_s21, %s920_s21, %s921_s22  }
  0x14   :  { %909 = dma.done.wait [#allocation3], 128  }
  0x15   :  { %910 = vsyncadd [#allocation3], 4294967168 }
  0x16   :  { %911 = dma.done.wait [#allocation6], 1536  }
  0x17   :  { %912 = vsyncadd [#allocation6], 4294965760 }
  0x18   :  { %913 = dma.done.wait [#allocation9], 2048  }
  0x19   :  { %914 = vsyncadd [#allocation9], 4294965248 }
  0x1a   :  { %915 = dma.done.wait [#allocation12], 1024  }
  0x1b   :  { %916 = vsyncadd [#allocation12], 4294966272  ;;  %v698_v0 = vld [vmem:[#allocation5 + $0x18] sm:$0xff]  ;;  %v697_v2 = vld [vmem:[#allocation5 + $0x10] sm:$0xff]  ;;  %vm163_vm0 = vcmask 523264   ;;  %s927_s25 = smov [#allocation13]  }
  0x1c   :  { %v706_v1 = vld [vmem:[#allocation7 + $0x38] sm:$0xff]  ;;  %171 = vmatpush.bf16.msra.mxu0 %v698_v0  ;;  %v705_v3 = vld [vmem:[#allocation7 + $0x30] sm:$0xff]  ;;  %v696_v4 = vld [vmem:[#allocation5 + $0x8] sm:$0xff]  ;;  %s537_s5 = sshll.u32 %s1041_s10, 4  ;;  %s538_s5 = int_to_ptr.hbm [resolvable:$true] %s537_s5 }
  0x1d   :  { %257 = vmatpush.bf16.msra.mxu1 %v706_v1  ;;  %v704_v5 = vld [vmem:[#allocation7 + $0x28] sm:$0xff]  ;;  %v695_v6 = vld [vmem:[#allocation5] sm:$0xff]  ;;  %v129_v7 = vld [vmem:[#allocation2] sm:$0xff] }
  0x1e   :  { %v703_v8 = vld [vmem:[#allocation7 + $0x20] sm:$0xff]  ;;  %v130_v9 = vpack.c.bf16 %v129_v7, %v129_v7  ;;  %v702_v10 = vld [vmem:[#allocation7 + $0x18] sm:$0xff]  ;;  %v701_v11 = vld [vmem:[#allocation7 + $0x10] sm:$0xff] }
  0x1f   :  { %v700_v12 = vld [vmem:[#allocation7 + $0x8] sm:$0xff]  ;;  %v699_v13 = vld [vmem:[#allocation7] sm:$0xff]  ;;  %v714_v14 = vld [vmem:[#allocation8 + $0x38] sm:$0xff] }
  0x20   :  { %172 = vmatpush.bf16.msra.mxu0 %v697_v2  ;;  %v730_v15 = vld [vmem:[#allocation11 + $0x38] sm:$0xff]  ;;  %344 = vmatpush.bf16.msra.mxu2 %v714_v14  ;;  %v713_v16 = vld [vmem:[#allocation8 + $0x30] sm:$0xff]  ;;  %v712_v18 = vld [vmem:[#allocation8 + $0x28] sm:$0xff] }
  0x21   :  { %258 = vmatpush.bf16.msra.mxu1 %v705_v3  ;;  %450 = vmatpush.bf16.msra.mxu3 %v730_v15  ;;  %v729_v17 = vld [vmem:[#allocation11 + $0x30] sm:$0xff]  ;;  %v728_v19 = vld [vmem:[#allocation11 + $0x28] sm:$0xff]  ;;  %v711_v20 = vld [vmem:[#allocation8 + $0x20] sm:$0xff] }
  0x22   :  { %v727_v21 = vld [vmem:[#allocation11 + $0x20] sm:$0xff]  ;;  %v181_v22 = vld [vmem:[%s1033_s2] sm:$0x1]  ;;  %v709_v27 = vld [vmem:[#allocation8 + $0x10] sm:$0xff] }
  0x23   :  { %v183_v23 = vpack.i.b16 %v181_v22, %v181_v22  ;;  %v710_v24 = vld [vmem:[#allocation8 + $0x18] sm:$0xff]  ;;  %v725_v28 = vld [vmem:[#allocation11 + $0x10] sm:$0xff]  ;;  %v708_v37 = vld [vmem:[#allocation8 + $0x8] sm:$0xff] }
  0x24   :  { %173 = vmatpush.bf16.msra.mxu0 %v696_v4  ;;  %345 = vmatpush.bf16.msra.mxu2 %v713_v16  ;;  %v726_v25 = vld [vmem:[#allocation11 + $0x18] sm:$0xff]  ;;  %v724_v38 = vld [vmem:[#allocation11 + $0x8] sm:$0xff]  ;;  %v707_v39 = vld [vmem:[#allocation8] sm:$0xff] }
  0x25   :  { %259 = vmatpush.bf16.msra.mxu1 %v704_v5  ;;  %451 = vmatpush.bf16.msra.mxu3 %v729_v17  ;;  %v185_v26 = vperm.slane %v183_v23, 0  ;;  %v723_v40 = vld [vmem:[#allocation11] sm:$0xff]  ;;  %v722_v41 = vld [vmem:[#allocation10 + $0x38] sm:$0xff]  ;;  %v721_v42 = vld [vmem:[#allocation10 + $0x30] sm:$0xff] }
  0x26   :  { %v720_v43 = vld [vmem:[#allocation10 + $0x28] sm:$0xff]  ;;  %v719_v44 = vld [vmem:[#allocation10 + $0x20] sm:$0xff]  ;;  %v271_v45 = vld [vmem:[%s1035_s4] sm:$0x1] }
  0x27   :  { %v187_v31 = vunpack.c.l.bf16 %v185_v26  ;;  %v718_v46 = vld [vmem:[#allocation10 + $0x18] sm:$0xff]  ;;  %v273_v47 = vpack.i.b16 %v271_v45, %v271_v45  ;;  %v717_v56 = vld [vmem:[#allocation10 + $0x10] sm:$0xff]  ;;  %v716_v57 = vld [vmem:[#allocation10 + $0x8] sm:$0xff] }
  0x28   :  { %174 = vmatpush.bf16.msra.mxu0 %v695_v6  ;;  %346 = vmatpush.bf16.msra.mxu2 %v712_v18  ;;  %v715_v58 = vld [vmem:[#allocation10] sm:$0xff]  ;;  %v358_v59 = vld [vmem:[%s1037_s6] sm:$0x1]  ;;  %s535_s6 = sshll.u32 %s927_s25, 4  ;;  %s536_s6 = int_to_ptr.vmem [resolvable:$true] %s535_s6 }
  0x29   :  { %260 = vmatpush.bf16.msra.mxu1 %v703_v8  ;;  %452 = vmatpush.bf16.msra.mxu3 %v728_v19  ;;  %v275_v48 = vperm.slane %v273_v47, 0  ;;  %v360_v60 = vpack.i.b16 %v358_v59, %v358_v59  ;;  %v740_v8 = vld [vmem:[%s1040_s9] ss:$0 sm:$0xff] }
  0x2b   :  { %566 = vmatmul.msk.bf16.vlgmr.msra.gmra.mxu0 %vm163_vm0, %v130_v9  ;;  %v277_v51 = vunpack.c.l.bf16 %v275_v48  ;;  %v362_v61 = vperm.slane %v360_v60, 0 }
  0x2c   :  { %347 = vmatpush.bf16.msra.mxu2 %v711_v20  ;;  %511 = vmatpush.bf16.msrb.mxu0 %v722_v41 }
  0x2d   :  { %261 = vmatpush.bf16.msra.mxu1 %v702_v10  ;;  %453 = vmatpush.bf16.msra.mxu3 %v727_v21  ;;  %v364_v1 = vunpack.c.l.bf16 %v362_v61 }
  0x30   :  { %348 = vmatpush.bf16.msra.mxu2 %v710_v24  ;;  %512 = vmatpush.bf16.msrb.mxu0 %v721_v42 }
  0x31   :  { %262 = vmatpush.bf16.msra.mxu1 %v701_v11  ;;  %454 = vmatpush.bf16.msra.mxu3 %v726_v25 }
  0x34   :  { %349 = vmatpush.bf16.msra.mxu2 %v709_v27  ;;  %513 = vmatpush.bf16.msrb.mxu0 %v720_v43 }
  0x35   :  { %263 = vmatpush.bf16.msra.mxu1 %v700_v12  ;;  %455 = vmatpush.bf16.msra.mxu3 %v725_v28 }
  0x38   :  { %350 = vmatpush.bf16.msra.mxu2 %v708_v37  ;;  %514 = vmatpush.bf16.msrb.mxu0 %v719_v44 }
  0x39   :  { %264 = vmatpush.bf16.msra.mxu1 %v699_v13  ;;  %456 = vmatpush.bf16.msra.mxu3 %v724_v38 }
  0x3c   :  { %351 = vmatpush.bf16.msra.mxu2 %v707_v39  ;;  %515 = vmatpush.bf16.msrb.mxu0 %v718_v46 }
  0x3d   :  { %457 = vmatpush.bf16.msra.mxu3 %v723_v40 }
  0x40   :  { %516 = vmatpush.bf16.msrb.mxu0 %v717_v56 }
  0x44   :  { %517 = vmatpush.bf16.msrb.mxu0 %v716_v57 }
  0x48   :  { %518 = vmatpush.bf16.msrb.mxu0 %v715_v58 }
  0xa8   :  { %v176_v29 = vpop.f32.mrf.mxu0 }
  0xa9   :  { %v180_v30 = vpack.c.bf16 %v176_v29, %v176_v29 }
  0xab   :  { %v186_v32 = vunpack.c.l.bf16 %v180_v30 }
  0xad   :  { %v188_v33 = vadd.f32 %v187_v31, %v186_v32 }
  0xaf   :  { %v191_v34 = vmax.f32 %v188_v33, 0.0 }
  0xb0   :  { %v178_v35 = vpop.f32.mrf.mxu0 }
  0xb1   :  { %v192_v36 = vpack.c.bf16 %v191_v34, %v191_v34 }
  0xb3   :  { %265 = vmatmul.bf16.vlgmr.msra.gmra.mxu1 %v192_v36 }
 0x130   :  { %v266_v49 = vpop.f32.mrf.mxu1 }
 0x131   :  { %v270_v50 = vpack.c.bf16 %v266_v49, %v266_v49 }
 0x133   :  { %v276_v52 = vunpack.c.l.bf16 %v270_v50 }
 0x135   :  { %v278_v53 = vadd.f32 %v277_v51, %v276_v52 }
 0x137   :  { %v279_v54 = vpack.c.bf16 %v278_v53, %v278_v53 }
 0x138   :  { %v268_v55 = vpop.f32.mrf.mxu1 }
 0x139   :  { %352 = vmatmul.bf16.vlgmr.msra.gmra.mxu2 %v279_v54  ;;  %458 = vmatmul.bf16.vlgmr.msra.gmra.mxu3 %v279_v54 }
 0x1bc   :  { %v353_v62 = vpop.f32.mrf.mxu2  ;;  %v459_v63 = vpop.f32.mrf.mxu3 }
 0x1bd   :  { %v357_v0 = vpack.c.bf16 %v353_v62, %v353_v62 }
 0x1bf   :  { %v363_v2 = vunpack.c.l.bf16 %v357_v0 }
 0x1c1   :  { %v365_v3 = vadd.f32 %v364_v1, %v363_v2 }
 0x1c3   :  { %v368_v4 = vmax.f32 %v365_v3, 0.0 }
 0x1c4   :  { %v355_v5 = vpop.f32.mrf.mxu2  ;;  %v461_v6 = vpop.f32.mrf.mxu3 }
 0x1c5   :  { %v369_v7 = vpack.c.bf16 %v368_v4, %v368_v4 }
 0x1c7   :  { %519 = vmatmul.bf16.vlgmr.msrb.gmra.mxu0 %v369_v7 }
 0x244   :  { %v520_v9 = vpop.f32.mrf.mxu0 }
 0x245   :  { %v521_v10 = vadd.f32 %v520_v9, %v459_v63 }
 0x247   :  { %v528_v11 = vadd.f32 %v740_v8, %v521_v10 }
 0x249   :  { %529 = vst [vmem:[#allocation13] sm:$0xff] %v528_v11 }
 0x24a   :  { %540 = dma.vmem_to_hbm [thread:$0]  %s536_s6, 128, %s538_s5, [#allocation4]  }
 0x24c   :  { %v522_v12 = vpop.f32.mrf.mxu0 }
 0x24d   :  { %917 = dma.done.wait [#allocation4], 128  }
 0x24e   :  { %918 = vsyncadd [#allocation4], 4294967168 }
 0x24f   :  { %545 = vsyncpa [#allocation3], 1 }
 0x250   :  { %546 = vsyncpa [#allocation6], 1 }
 0x251   :  { %547 = vsyncpa [#allocation9], 1 }
 0x252   :  { %548 = vsyncpa [#allocation12], 1 }
 0x253   :  { %549 = vsyncpa [#allocation4], 1 }

</bundles_post_ra>
